<compile_context>
chip_gen: v6e
topology: v6e:2x2x1
jax: 0.10.0
libtpu: 0.0.40
codegen_flags: <defaults>
</compile_context>

<pallas_src>
import functools

import jax
import jax.numpy as jnp
import numpy as np
from jax import lax
from jax.experimental import pallas as pl
from jax.experimental.pallas import tpu as pltpu

EPS = 1e-5


def _round_up(v, m):
    return (v + m - 1) // m * m


# ----------------- shared conv tile: shift-and-matmul (in-kernel im2col) --------
def _conv_acc(x_ref, w_ref, *, kh, kw, w_in, hw_out):
    """Conv for one image as KH*KW shifted MXU matmuls.

    x_ref: (1, Cp, HWp) bf16  flattened-spatial input slab (zero-padded tail)
    w_ref: (KH*KW, OCp, Cp) bf16
    Returns (OCp, hw_out) f32 with hw_out = OH * W_in; columns whose
    (col % W_in) >= OW are wrap-around garbage (masked / sliced off later).
    """
    ocp = w_ref.shape[1]
    acc = jnp.zeros((ocp, hw_out), jnp.float32)
    for i in range(kh):                      # static, unrolled (KH*KW small)
        for j in range(kw):
            q = i * kw + j
            off = i * w_in + j
            xq = x_ref[0, :, off:off + hw_out]          # (Cp, hw_out) bf16
            acc += jnp.dot(w_ref[q], xq, preferred_element_type=jnp.float32)
    return acc


# --------------------------- Pass 1: conv + BN stats ----------------------------
def conv_stats_kernel(x_ref, w_ref, mask_ref, sum_ref, sq_ref, *,
                      kh, kw, w_in, hw_out):
    # mask_ref: (1, hw_out) f32, 1.0 on valid output columns, 0.0 on garbage.
    acc = _conv_acc(x_ref, w_ref, kh=kh, kw=kw, w_in=w_in, hw_out=hw_out)
    yv = acc * mask_ref[...]
    sum_ref[0] = jnp.sum(yv, axis=1, keepdims=True)          # (OCp, 1)
    sq_ref[0] = jnp.sum(yv * yv, axis=1, keepdims=True)


# ----------------------- Pass 2: conv recompute + BN + ReLU ---------------------
def conv_bn_relu_kernel(x_ref, w_ref, scale_ref, shift_ref, o_ref, *,
                        kh, kw, w_in, hw_out):
    acc = _conv_acc(x_ref, w_ref, kh=kh, kw=kw, w_in=w_in, hw_out=hw_out)
    y = acc * scale_ref[...] + shift_ref[...]                 # all f32 VPU math
    o_ref[0] = jnp.maximum(y, 0.0).astype(o_ref.dtype)


# ------------------------------------ wrapper -----------------------------------
@functools.partial(jax.jit, static_argnames=("kernel_size", "stride"))
def conv_block_forward(x, weight, bias, gamma, beta, *, kernel_size=3, stride=1):
    """x: (N, C, H, W) f32.  weight: (OC, C, KH, KW).  Returns (N, OC, OH, OW)."""
    del bias  # cancels exactly under training-mode BatchNorm
    if stride != 1:
        # TODO(synk): stride > 1 (module default is 1).
        raise NotImplementedError("in-kernel patch builder supports stride=1 only")

    n, c, h, w_in = x.shape
    oc, c_w, kh, kw = weight.shape
    assert c_w == c and kh == kernel_size and kw == kernel_size

    oh = h - kh + 1
    ow = w_in - kw + 1
    hw_out = oh * w_in                         # OW valid + (KW-1) garbage cols/row
    cp = _round_up(c, 8)                       # sublane-align the contraction dim
    ocp = _round_up(oc, 8)                     # OC lives on sublanes -> pad to 8
    hwp = _round_up(h * w_in + kw - 1, 128)    # lane-align flattened spatial + halo

    # x: NCHW -> (N, Cp, HWp) bf16 (flatten spatial, pad channels + tail).
    x_p = jnp.pad(x.astype(jnp.bfloat16).reshape(n, c, h * w_in),
                  ((0, 0), (0, cp - c), (0, hwp - h * w_in)))
    # weight: (OC, C, KH, KW) -> (KH*KW, OCp, Cp) bf16, q = i*KW + j.
    w_p = jnp.pad(weight.astype(jnp.bfloat16).transpose(2, 3, 0, 1)
                  .reshape(kh * kw, oc, c),
                  ((0, 0), (0, ocp - oc), (0, cp - c)))
    # Valid-column mask for the stats pass (garbage cols from the width wrap).
    col_mask = jnp.tile(jnp.arange(w_in) < ow, (oh,)).astype(jnp.float32)
    col_mask = col_mask.reshape(1, hw_out)

    # ---- Pass 1: conv + per-image per-channel sums (fully parallel grid) ------
    psum, psq = pl.pallas_call(
        functools.partial(conv_stats_kernel, kh=kh, kw=kw, w_in=w_in,
                          hw_out=hw_out),
        out_shape=(jax.ShapeDtypeStruct((n, ocp, 1), jnp.float32),
                   jax.ShapeDtypeStruct((n, ocp, 1), jnp.float32)),
        grid=(n,),
        in_specs=[pl.BlockSpec((1, cp, hwp), lambda i: (i, 0, 0)),
                  pl.BlockSpec((kh * kw, ocp, cp), lambda i: (0, 0, 0)),
                  pl.BlockSpec((1, hw_out), lambda i: (0, 0))],
        out_specs=(pl.BlockSpec((1, ocp, 1), lambda i: (i, 0, 0)),
                   pl.BlockSpec((1, ocp, 1), lambda i: (i, 0, 0))),
        compiler_params=pltpu.CompilerParams(
            dimension_semantics=("parallel",)),
        cost_estimate=pl.CostEstimate(
            flops=2 * n * kh * kw * ocp * cp * hw_out, transcendentals=0,
            bytes_accessed=2 * n * cp * hwp + 2 * kh * kw * ocp * cp
                           + 4 * hw_out + 8 * n * ocp),
    )(x_p, w_p, col_mask)

    # ---- BN finalize (tiny per-channel math; biased batch variance) -----------
    m_valid = jnp.float32(n * oh * ow)
    ssum = jnp.sum(psum[:, :, 0], axis=0)                     # (OCp,)
    ssq = jnp.sum(psq[:, :, 0], axis=0)
    mean = ssum / m_valid
    var = jnp.maximum(ssq / m_valid - mean * mean, 0.0)
    gamma_p = jnp.pad(gamma.astype(jnp.float32), (0, ocp - oc))
    beta_p = jnp.pad(beta.astype(jnp.float32), (0, ocp - oc))
    scale = gamma_p * lax.rsqrt(var + EPS)
    shift = beta_p - mean * scale
    scale2 = scale.reshape(ocp, 1)
    shift2 = shift.reshape(ocp, 1)

    # ---- Pass 2: recompute conv, apply folded BN + ReLU, lane-dense output ----
    out_flat = pl.pallas_call(
        functools.partial(conv_bn_relu_kernel, kh=kh, kw=kw, w_in=w_in,
                          hw_out=hw_out),
        out_shape=jax.ShapeDtypeStruct((n, ocp, hw_out), jnp.float32),
        grid=(n,),
        in_specs=[pl.BlockSpec((1, cp, hwp), lambda i: (i, 0, 0)),
                  pl.BlockSpec((kh * kw, ocp, cp), lambda i: (0, 0, 0)),
                  pl.BlockSpec((ocp, 1), lambda i: (0, 0)),
                  pl.BlockSpec((ocp, 1), lambda i: (0, 0))],
        out_specs=pl.BlockSpec((1, ocp, hw_out), lambda i: (i, 0, 0)),
        compiler_params=pltpu.CompilerParams(
            dimension_semantics=("parallel",)),
        cost_estimate=pl.CostEstimate(
            flops=2 * n * kh * kw * ocp * cp * hw_out + 3 * n * ocp * hw_out,
            transcendentals=0,
            bytes_accessed=2 * n * cp * hwp + 2 * kh * kw * ocp * cp
                           + 8 * ocp + 4 * n * ocp * hw_out),
    )(x_p, w_p, scale2, shift2)

    # Drop padded channels + wrap-around garbage columns (real-size data only).
    out = out_flat.reshape(n, ocp, oh, w_in)[:, :oc, :, :ow]
    return out


# --------------------------------- reference ------------------------------------
def _reference(x, weight, bias, gamma, beta):
    oc = weight.shape[0]
    y = lax.conv_general_dilated(
        x, weight, window_strides=(1, 1), padding="VALID",
        dimension_numbers=("NCHW", "OIHW", "NCHW"),
        precision=lax.Precision.HIGHEST,
    ) + bias.reshape(1, oc, 1, 1)
    mean = y.mean(axis=(0, 2, 3), keepdims=True)
    var = ((y - mean) ** 2).mean(axis=(0, 2, 3), keepdims=True)
    y_bn = (y - mean) / jnp.sqrt(var + EPS) * gamma.reshape(1, oc, 1, 1) \
        + beta.reshape(1, oc, 1, 1)
    return jnp.maximum(y_bn, 0.0)


if __name__ == "__main__":
    # Shapes consistent with ConvBlock(in_channels=4, out_channels=8)
    N, C, H, W = 2, 4, 16, 16
    OC, K = 8, 3

    key = jax.random.PRNGKey(0)
    kx, kw_key, kb, kg, kbe = jax.random.split(key, 5)

    # Quantize x / weight to the bf16 grid so MXU bf16 products are exact and
    # the 1e-4 accuracy check stays tight.
    x = jax.random.normal(kx, (N, C, H, W), dtype=jnp.float32)
    x = x.astype(jnp.bfloat16).astype(jnp.float32)

    fan_in = C * K * K
    bound = 1.0 / np.sqrt(fan_in)
    weight = jax.random.uniform(kw_key, (OC, C, K, K), jnp.float32, -bound, bound)
    weight = weight.astype(jnp.bfloat16).astype(jnp.float32)
    bias = jax.random.uniform(kb, (OC,), jnp.float32, -bound, bound)
    gamma = jax.random.uniform(kg, (OC,), jnp.float32, 0.5, 1.5)
    beta = jax.random.uniform(kbe, (OC,), jnp.float32, -0.5, 0.5)

    out = conv_block_forward(x, weight, bias, gamma, beta, kernel_size=K, stride=1)
    out = jax.block_until_ready(out)

    ref = jax.block_until_ready(_reference(x, weight, bias, gamma, beta))
    assert out.shape == (N, OC, H - K + 1, W - K + 1), out.shape
    np.testing.assert_allclose(np.asarray(out), np.asarray(ref), atol=1e-4, rtol=1e-4)

    print("KERNEL_OK")
</pallas_src>

<mosaic_0001>
module attributes {stable_mosaic.version = 11 : i64} {
  func.func @conv_stats_kernel(%arg0: i32, %arg1: memref<1x8x384xbf16, #tpu.memory_space<vmem>>, %arg2: memref<9x8x8xbf16, #tpu.memory_space<vmem>>, %arg3: memref<1x224xf32, #tpu.memory_space<vmem>>, %arg4: memref<1x8x1xf32, #tpu.memory_space<vmem>>, %arg5: memref<1x8x1xf32, #tpu.memory_space<vmem>>) attributes {dimension_semantics = [#tpu.dimension_semantics<parallel>], iteration_bounds = array<i64: 2>, scalar_prefetch = 0 : i64, scratch_operands = 0 : i64, tpu.core_type = #tpu.core_type<tc>, window_params = [{transform_indices = @transform_0, window_bounds = array<i64: 1, 8, 384>}, {pipeline_mode = #tpu.pipeline_mode<synchronous>, transform_indices = @transform_1, window_bounds = array<i64: 9, 8, 8>}, {pipeline_mode = #tpu.pipeline_mode<synchronous>, transform_indices = @transform_2, window_bounds = array<i64: 1, 224>}, {transform_indices = @transform_3, window_bounds = array<i64: 1, 8, 1>}, {transform_indices = @transform_4, window_bounds = array<i64: 1, 8, 1>}]} {
    %cst = arith.constant 0.000000e+00 : f32
    %0 = vector.broadcast %cst : f32 to vector<8x224xf32>
    %c0 = arith.constant 0 : index
    %c0_0 = arith.constant 0 : index
    %c0_1 = arith.constant 0 : index
    %1 = vector.load %arg1[%c0, %c0_0, %c0_1] : memref<1x8x384xbf16, #tpu.memory_space<vmem>>, vector<1x8x224xbf16>
    %2 = vector.shape_cast %1 : vector<1x8x224xbf16> to vector<8x224xbf16>
    %c0_2 = arith.constant 0 : index
    %c0_3 = arith.constant 0 : index
    %c0_4 = arith.constant 0 : index
    %3 = vector.load %arg2[%c0_2, %c0_3, %c0_4] : memref<9x8x8xbf16, #tpu.memory_space<vmem>>, vector<1x8x8xbf16>
    %4 = vector.shape_cast %3 : vector<1x8x8xbf16> to vector<8x8xbf16>
    %cst_5 = arith.constant dense<0.000000e+00> : vector<8x224xf32>
    %5 = tpu.matmul %4, %2, %cst_5 {dimension_numbers = #tpu.dot_dimension_numbers<[1], [0], [0], [1], [0, 0, 1, 1], [], []>} : vector<8x8xbf16>, vector<8x224xbf16>, vector<8x224xf32> -> vector<8x224xf32>
    %6 = arith.addf %0, %5 : vector<8x224xf32>
    %c0_6 = arith.constant 0 : index
    %c0_7 = arith.constant 0 : index
    %c1 = arith.constant 1 : index
    %7 = vector.load %arg1[%c0_6, %c0_7, %c1] : memref<1x8x384xbf16, #tpu.memory_space<vmem>>, vector<1x8x224xbf16>
    %8 = vector.shape_cast %7 : vector<1x8x224xbf16> to vector<8x224xbf16>
    %c1_8 = arith.constant 1 : index
    %c0_9 = arith.constant 0 : index
    %c0_10 = arith.constant 0 : index
    %9 = vector.load %arg2[%c1_8, %c0_9, %c0_10] : memref<9x8x8xbf16, #tpu.memory_space<vmem>>, vector<1x8x8xbf16>
    %10 = vector.shape_cast %9 : vector<1x8x8xbf16> to vector<8x8xbf16>
    %cst_11 = arith.constant dense<0.000000e+00> : vector<8x224xf32>
    %11 = tpu.matmul %10, %8, %cst_11 {dimension_numbers = #tpu.dot_dimension_numbers<[1], [0], [0], [1], [0, 0, 1, 1], [], []>} : vector<8x8xbf16>, vector<8x224xbf16>, vector<8x224xf32> -> vector<8x224xf32>
    %12 = arith.addf %6, %11 : vector<8x224xf32>
    %c0_12 = arith.constant 0 : index
    %c0_13 = arith.constant 0 : index
    %c2 = arith.constant 2 : index
    %13 = vector.load %arg1[%c0_12, %c0_13, %c2] : memref<1x8x384xbf16, #tpu.memory_space<vmem>>, vector<1x8x224xbf16>
    %14 = vector.shape_cast %13 : vector<1x8x224xbf16> to vector<8x224xbf16>
    %c2_14 = arith.constant 2 : index
    %c0_15 = arith.constant 0 : index
    %c0_16 = arith.constant 0 : index
    %15 = vector.load %arg2[%c2_14, %c0_15, %c0_16] : memref<9x8x8xbf16, #tpu.memory_space<vmem>>, vector<1x8x8xbf16>
    %16 = vector.shape_cast %15 : vector<1x8x8xbf16> to vector<8x8xbf16>
    %cst_17 = arith.constant dense<0.000000e+00> : vector<8x224xf32>
    %17 = tpu.matmul %16, %14, %cst_17 {dimension_numbers = #tpu.dot_dimension_numbers<[1], [0], [0], [1], [0, 0, 1, 1], [], []>} : vector<8x8xbf16>, vector<8x224xbf16>, vector<8x224xf32> -> vector<8x224xf32>
    %18 = arith.addf %12, %17 : vector<8x224xf32>
    %c0_18 = arith.constant 0 : index
    %c0_19 = arith.constant 0 : index
    %c16 = arith.constant 16 : index
    %19 = vector.load %arg1[%c0_18, %c0_19, %c16] : memref<1x8x384xbf16, #tpu.memory_space<vmem>>, vector<1x8x224xbf16>
    %20 = vector.shape_cast %19 : vector<1x8x224xbf16> to vector<8x224xbf16>
    %c3 = arith.constant 3 : index
    %c0_20 = arith.constant 0 : index
    %c0_21 = arith.constant 0 : index
    %21 = vector.load %arg2[%c3, %c0_20, %c0_21] : memref<9x8x8xbf16, #tpu.memory_space<vmem>>, vector<1x8x8xbf16>
    %22 = vector.shape_cast %21 : vector<1x8x8xbf16> to vector<8x8xbf16>
    %cst_22 = arith.constant dense<0.000000e+00> : vector<8x224xf32>
    %23 = tpu.matmul %22, %20, %cst_22 {dimension_numbers = #tpu.dot_dimension_numbers<[1], [0], [0], [1], [0, 0, 1, 1], [], []>} : vector<8x8xbf16>, vector<8x224xbf16>, vector<8x224xf32> -> vector<8x224xf32>
    %24 = arith.addf %18, %23 : vector<8x224xf32>
    %c0_23 = arith.constant 0 : index
    %c0_24 = arith.constant 0 : index
    %c17 = arith.constant 17 : index
    %25 = vector.load %arg1[%c0_23, %c0_24, %c17] : memref<1x8x384xbf16, #tpu.memory_space<vmem>>, vector<1x8x224xbf16>
    %26 = vector.shape_cast %25 : vector<1x8x224xbf16> to vector<8x224xbf16>
    %c4 = arith.constant 4 : index
    %c0_25 = arith.constant 0 : index
    %c0_26 = arith.constant 0 : index
    %27 = vector.load %arg2[%c4, %c0_25, %c0_26] : memref<9x8x8xbf16, #tpu.memory_space<vmem>>, vector<1x8x8xbf16>
    %28 = vector.shape_cast %27 : vector<1x8x8xbf16> to vector<8x8xbf16>
    %cst_27 = arith.constant dense<0.000000e+00> : vector<8x224xf32>
    %29 = tpu.matmul %28, %26, %cst_27 {dimension_numbers = #tpu.dot_dimension_numbers<[1], [0], [0], [1], [0, 0, 1, 1], [], []>} : vector<8x8xbf16>, vector<8x224xbf16>, vector<8x224xf32> -> vector<8x224xf32>
    %30 = arith.addf %24, %29 : vector<8x224xf32>
    %c0_28 = arith.constant 0 : index
    %c0_29 = arith.constant 0 : index
    %c18 = arith.constant 18 : index
    %31 = vector.load %arg1[%c0_28, %c0_29, %c18] : memref<1x8x384xbf16, #tpu.memory_space<vmem>>, vector<1x8x224xbf16>
    %32 = vector.shape_cast %31 : vector<1x8x224xbf16> to vector<8x224xbf16>
    %c5 = arith.constant 5 : index
    %c0_30 = arith.constant 0 : index
    %c0_31 = arith.constant 0 : index
    %33 = vector.load %arg2[%c5, %c0_30, %c0_31] : memref<9x8x8xbf16, #tpu.memory_space<vmem>>, vector<1x8x8xbf16>
    %34 = vector.shape_cast %33 : vector<1x8x8xbf16> to vector<8x8xbf16>
    %cst_32 = arith.constant dense<0.000000e+00> : vector<8x224xf32>
    %35 = tpu.matmul %34, %32, %cst_32 {dimension_numbers = #tpu.dot_dimension_numbers<[1], [0], [0], [1], [0, 0, 1, 1], [], []>} : vector<8x8xbf16>, vector<8x224xbf16>, vector<8x224xf32> -> vector<8x224xf32>
    %36 = arith.addf %30, %35 : vector<8x224xf32>
    %c0_33 = arith.constant 0 : index
    %c0_34 = arith.constant 0 : index
    %c32 = arith.constant 32 : index
    %37 = vector.load %arg1[%c0_33, %c0_34, %c32] : memref<1x8x384xbf16, #tpu.memory_space<vmem>>, vector<1x8x224xbf16>
    %38 = vector.shape_cast %37 : vector<1x8x224xbf16> to vector<8x224xbf16>
    %c6 = arith.constant 6 : index
    %c0_35 = arith.constant 0 : index
    %c0_36 = arith.constant 0 : index
    %39 = vector.load %arg2[%c6, %c0_35, %c0_36] : memref<9x8x8xbf16, #tpu.memory_space<vmem>>, vector<1x8x8xbf16>
    %40 = vector.shape_cast %39 : vector<1x8x8xbf16> to vector<8x8xbf16>
    %cst_37 = arith.constant dense<0.000000e+00> : vector<8x224xf32>
    %41 = tpu.matmul %40, %38, %cst_37 {dimension_numbers = #tpu.dot_dimension_numbers<[1], [0], [0], [1], [0, 0, 1, 1], [], []>} : vector<8x8xbf16>, vector<8x224xbf16>, vector<8x224xf32> -> vector<8x224xf32>
    %42 = arith.addf %36, %41 : vector<8x224xf32>
    %c0_38 = arith.constant 0 : index
    %c0_39 = arith.constant 0 : index
    %c33 = arith.constant 33 : index
    %43 = vector.load %arg1[%c0_38, %c0_39, %c33] : memref<1x8x384xbf16, #tpu.memory_space<vmem>>, vector<1x8x224xbf16>
    %44 = vector.shape_cast %43 : vector<1x8x224xbf16> to vector<8x224xbf16>
    %c7 = arith.constant 7 : index
    %c0_40 = arith.constant 0 : index
    %c0_41 = arith.constant 0 : index
    %45 = vector.load %arg2[%c7, %c0_40, %c0_41] : memref<9x8x8xbf16, #tpu.memory_space<vmem>>, vector<1x8x8xbf16>
    %46 = vector.shape_cast %45 : vector<1x8x8xbf16> to vector<8x8xbf16>
    %cst_42 = arith.constant dense<0.000000e+00> : vector<8x224xf32>
    %47 = tpu.matmul %46, %44, %cst_42 {dimension_numbers = #tpu.dot_dimension_numbers<[1], [0], [0], [1], [0, 0, 1, 1], [], []>} : vector<8x8xbf16>, vector<8x224xbf16>, vector<8x224xf32> -> vector<8x224xf32>
    %48 = arith.addf %42, %47 : vector<8x224xf32>
    %c0_43 = arith.constant 0 : index
    %c0_44 = arith.constant 0 : index
    %c34 = arith.constant 34 : index
    %49 = vector.load %arg1[%c0_43, %c0_44, %c34] : memref<1x8x384xbf16, #tpu.memory_space<vmem>>, vector<1x8x224xbf16>
    %50 = vector.shape_cast %49 : vector<1x8x224xbf16> to vector<8x224xbf16>
    %c8 = arith.constant 8 : index
    %c0_45 = arith.constant 0 : index
    %c0_46 = arith.constant 0 : index
    %51 = vector.load %arg2[%c8, %c0_45, %c0_46] : memref<9x8x8xbf16, #tpu.memory_space<vmem>>, vector<1x8x8xbf16>
    %52 = vector.shape_cast %51 : vector<1x8x8xbf16> to vector<8x8xbf16>
    %cst_47 = arith.constant dense<0.000000e+00> : vector<8x224xf32>
    %53 = tpu.matmul %52, %50, %cst_47 {dimension_numbers = #tpu.dot_dimension_numbers<[1], [0], [0], [1], [0, 0, 1, 1], [], []>} : vector<8x8xbf16>, vector<8x224xbf16>, vector<8x224xf32> -> vector<8x224xf32>
    %54 = arith.addf %48, %53 : vector<8x224xf32>
    %c0_48 = arith.constant 0 : index
    %c0_49 = arith.constant 0 : index
    %55 = vector.load %arg3[%c0_48, %c0_49] : memref<1x224xf32, #tpu.memory_space<vmem>>, vector<1x224xf32>
    %56 = vector.broadcast %55 : vector<1x224xf32> to vector<8x224xf32>
    %57 = arith.mulf %54, %56 : vector<8x224xf32>
    %cst_50 = arith.constant dense<0.000000e+00> : vector<8xf32>
    %58 = vector.multi_reduction <add>, %57, %cst_50 [1] : vector<8x224xf32> to vector<8xf32>
    %59 = vector.shape_cast %58 : vector<8xf32> to vector<8x1xf32>
    %c0_51 = arith.constant 0 : index
    %c0_52 = arith.constant 0 : index
    %c0_53 = arith.constant 0 : index
    %60 = vector.load %arg4[%c0_51, %c0_52, %c0_53] : memref<1x8x1xf32, #tpu.memory_space<vmem>>, vector<1x8x1xf32>
    %61 = vector.shape_cast %60 : vector<1x8x1xf32> to vector<8x1xf32>
    %62 = vector.shape_cast %59 : vector<8x1xf32> to vector<1x8x1xf32>
    tpu.vector_store %arg4[%c0_51, %c0_52, %c0_53], %62 {strides = array<i32>} : memref<1x8x1xf32, #tpu.memory_space<vmem>>, vector<1x8x1xf32>,
    %63 = arith.mulf %57, %57 : vector<8x224xf32>
    %cst_54 = arith.constant dense<0.000000e+00> : vector<8xf32>
    %64 = vector.multi_reduction <add>, %63, %cst_54 [1] : vector<8x224xf32> to vector<8xf32>
    %65 = vector.shape_cast %64 : vector<8xf32> to vector<8x1xf32>
    %c0_55 = arith.constant 0 : index
    %c0_56 = arith.constant 0 : index
    %c0_57 = arith.constant 0 : index
    %66 = vector.load %arg5[%c0_55, %c0_56, %c0_57] : memref<1x8x1xf32, #tpu.memory_space<vmem>>, vector<1x8x1xf32>
    %67 = vector.shape_cast %66 : vector<1x8x1xf32> to vector<8x1xf32>
    %68 = vector.shape_cast %65 : vector<8x1xf32> to vector<1x8x1xf32>
    tpu.vector_store %arg5[%c0_55, %c0_56, %c0_57], %68 {strides = array<i32>} : memref<1x8x1xf32, #tpu.memory_space<vmem>>, vector<1x8x1xf32>,
    return
  }
  func.func @transform_0(%arg0: i32) -> (i32, i32, i32) {
    %c0_i32 = arith.constant 0 : i32
    %c0_i32_0 = arith.constant 0 : i32
    %c0_i32_1 = arith.constant 0 : i32
    return %arg0, %c0_i32, %c0_i32_0 : i32, i32, i32
  }
  func.func @transform_1(%arg0: i32) -> (i32, i32, i32) {
    %c0_i32 = arith.constant 0 : i32
    %c0_i32_0 = arith.constant 0 : i32
    %c0_i32_1 = arith.constant 0 : i32
    %c0_i32_2 = arith.constant 0 : i32
    return %c0_i32, %c0_i32_0, %c0_i32_1 : i32, i32, i32
  }
  func.func @transform_2(%arg0: i32) -> (i32, i32) {
    %c0_i32 = arith.constant 0 : i32
    %c0_i32_0 = arith.constant 0 : i32
    %c0_i32_1 = arith.constant 0 : i32
    return %c0_i32, %c0_i32_0 : i32, i32
  }
  func.func @transform_3(%arg0: i32) -> (i32, i32, i32) {
    %c0_i32 = arith.constant 0 : i32
    %c0_i32_0 = arith.constant 0 : i32
    %c0_i32_1 = arith.constant 0 : i32
    return %arg0, %c0_i32, %c0_i32_0 : i32, i32, i32
  }
  func.func @transform_4(%arg0: i32) -> (i32, i32, i32) {
    %c0_i32 = arith.constant 0 : i32
    %c0_i32_0 = arith.constant 0 : i32
    %c0_i32_1 = arith.constant 0 : i32
    return %arg0, %c0_i32, %c0_i32_0 : i32, i32, i32
  }
}

module attributes {stable_mosaic.version = 11 : i64} {
  func.func @conv_bn_relu_kernel(%arg0: i32, %arg1: memref<1x8x384xbf16, #tpu.memory_space<vmem>>, %arg2: memref<9x8x8xbf16, #tpu.memory_space<vmem>>, %arg3: memref<8x1xf32, #tpu.memory_space<vmem>>, %arg4: memref<8x1xf32, #tpu.memory_space<vmem>>, %arg5: memref<1x8x224xf32, #tpu.memory_space<vmem>>) attributes {dimension_semantics = [#tpu.dimension_semantics<parallel>], iteration_bounds = array<i64: 2>, scalar_prefetch = 0 : i64, scratch_operands = 0 : i64, tpu.core_type = #tpu.core_type<tc>, window_params = [{transform_indices = @transform_0, window_bounds = array<i64: 1, 8, 384>}, {pipeline_mode = #tpu.pipeline_mode<synchronous>, transform_indices = @transform_1, window_bounds = array<i64: 9, 8, 8>}, {pipeline_mode = #tpu.pipeline_mode<synchronous>, transform_indices = @transform_2, window_bounds = array<i64: 8, 1>}, {pipeline_mode = #tpu.pipeline_mode<synchronous>, transform_indices = @transform_3, window_bounds = array<i64: 8, 1>}, {transform_indices = @transform_4, window_bounds = array<i64: 1, 8, 224>}]} {
    %cst = arith.constant 0.000000e+00 : f32
    %0 = vector.broadcast %cst : f32 to vector<8x224xf32>
    %c0 = arith.constant 0 : index
    %c0_0 = arith.constant 0 : index
    %c0_1 = arith.constant 0 : index
    %1 = vector.load %arg1[%c0, %c0_0, %c0_1] : memref<1x8x384xbf16, #tpu.memory_space<vmem>>, vector<1x8x224xbf16>
    %2 = vector.shape_cast %1 : vector<1x8x224xbf16> to vector<8x224xbf16>
    %c0_2 = arith.constant 0 : index
    %c0_3 = arith.constant 0 : index
    %c0_4 = arith.constant 0 : index
    %3 = vector.load %arg2[%c0_2, %c0_3, %c0_4] : memref<9x8x8xbf16, #tpu.memory_space<vmem>>, vector<1x8x8xbf16>
    %4 = vector.shape_cast %3 : vector<1x8x8xbf16> to vector<8x8xbf16>
    %cst_5 = arith.constant dense<0.000000e+00> : vector<8x224xf32>
    %5 = tpu.matmul %4, %2, %cst_5 {dimension_numbers = #tpu.dot_dimension_numbers<[1], [0], [0], [1], [0, 0, 1, 1], [], []>} : vector<8x8xbf16>, vector<8x224xbf16>, vector<8x224xf32> -> vector<8x224xf32>
    %6 = arith.addf %0, %5 : vector<8x224xf32>
    %c0_6 = arith.constant 0 : index
    %c0_7 = arith.constant 0 : index
    %c1 = arith.constant 1 : index
    %7 = vector.load %arg1[%c0_6, %c0_7, %c1] : memref<1x8x384xbf16, #tpu.memory_space<vmem>>, vector<1x8x224xbf16>
    %8 = vector.shape_cast %7 : vector<1x8x224xbf16> to vector<8x224xbf16>
    %c1_8 = arith.constant 1 : index
    %c0_9 = arith.constant 0 : index
    %c0_10 = arith.constant 0 : index
    %9 = vector.load %arg2[%c1_8, %c0_9, %c0_10] : memref<9x8x8xbf16, #tpu.memory_space<vmem>>, vector<1x8x8xbf16>
    %10 = vector.shape_cast %9 : vector<1x8x8xbf16> to vector<8x8xbf16>
    %cst_11 = arith.constant dense<0.000000e+00> : vector<8x224xf32>
    %11 = tpu.matmul %10, %8, %cst_11 {dimension_numbers = #tpu.dot_dimension_numbers<[1], [0], [0], [1], [0, 0, 1, 1], [], []>} : vector<8x8xbf16>, vector<8x224xbf16>, vector<8x224xf32> -> vector<8x224xf32>
    %12 = arith.addf %6, %11 : vector<8x224xf32>
    %c0_12 = arith.constant 0 : index
    %c0_13 = arith.constant 0 : index
    %c2 = arith.constant 2 : index
    %13 = vector.load %arg1[%c0_12, %c0_13, %c2] : memref<1x8x384xbf16, #tpu.memory_space<vmem>>, vector<1x8x224xbf16>
    %14 = vector.shape_cast %13 : vector<1x8x224xbf16> to vector<8x224xbf16>
    %c2_14 = arith.constant 2 : index
    %c0_15 = arith.constant 0 : index
    %c0_16 = arith.constant 0 : index
    %15 = vector.load %arg2[%c2_14, %c0_15, %c0_16] : memref<9x8x8xbf16, #tpu.memory_space<vmem>>, vector<1x8x8xbf16>
    %16 = vector.shape_cast %15 : vector<1x8x8xbf16> to vector<8x8xbf16>
    %cst_17 = arith.constant dense<0.000000e+00> : vector<8x224xf32>
    %17 = tpu.matmul %16, %14, %cst_17 {dimension_numbers = #tpu.dot_dimension_numbers<[1], [0], [0], [1], [0, 0, 1, 1], [], []>} : vector<8x8xbf16>, vector<8x224xbf16>, vector<8x224xf32> -> vector<8x224xf32>
    %18 = arith.addf %12, %17 : vector<8x224xf32>
    %c0_18 = arith.constant 0 : index
    %c0_19 = arith.constant 0 : index
    %c16 = arith.constant 16 : index
    %19 = vector.load %arg1[%c0_18, %c0_19, %c16] : memref<1x8x384xbf16, #tpu.memory_space<vmem>>, vector<1x8x224xbf16>
    %20 = vector.shape_cast %19 : vector<1x8x224xbf16> to vector<8x224xbf16>
    %c3 = arith.constant 3 : index
    %c0_20 = arith.constant 0 : index
    %c0_21 = arith.constant 0 : index
    %21 = vector.load %arg2[%c3, %c0_20, %c0_21] : memref<9x8x8xbf16, #tpu.memory_space<vmem>>, vector<1x8x8xbf16>
    %22 = vector.shape_cast %21 : vector<1x8x8xbf16> to vector<8x8xbf16>
    %cst_22 = arith.constant dense<0.000000e+00> : vector<8x224xf32>
    %23 = tpu.matmul %22, %20, %cst_22 {dimension_numbers = #tpu.dot_dimension_numbers<[1], [0], [0], [1], [0, 0, 1, 1], [], []>} : vector<8x8xbf16>, vector<8x224xbf16>, vector<8x224xf32> -> vector<8x224xf32>
    %24 = arith.addf %18, %23 : vector<8x224xf32>
    %c0_23 = arith.constant 0 : index
    %c0_24 = arith.constant 0 : index
    %c17 = arith.constant 17 : index
    %25 = vector.load %arg1[%c0_23, %c0_24, %c17] : memref<1x8x384xbf16, #tpu.memory_space<vmem>>, vector<1x8x224xbf16>
    %26 = vector.shape_cast %25 : vector<1x8x224xbf16> to vector<8x224xbf16>
    %c4 = arith.constant 4 : index
    %c0_25 = arith.constant 0 : index
    %c0_26 = arith.constant 0 : index
    %27 = vector.load %arg2[%c4, %c0_25, %c0_26] : memref<9x8x8xbf16, #tpu.memory_space<vmem>>, vector<1x8x8xbf16>
    %28 = vector.shape_cast %27 : vector<1x8x8xbf16> to vector<8x8xbf16>
    %cst_27 = arith.constant dense<0.000000e+00> : vector<8x224xf32>
    %29 = tpu.matmul %28, %26, %cst_27 {dimension_numbers = #tpu.dot_dimension_numbers<[1], [0], [0], [1], [0, 0, 1, 1], [], []>} : vector<8x8xbf16>, vector<8x224xbf16>, vector<8x224xf32> -> vector<8x224xf32>
    %30 = arith.addf %24, %29 : vector<8x224xf32>
    %c0_28 = arith.constant 0 : index
    %c0_29 = arith.constant 0 : index
    %c18 = arith.constant 18 : index
    %31 = vector.load %arg1[%c0_28, %c0_29, %c18] : memref<1x8x384xbf16, #tpu.memory_space<vmem>>, vector<1x8x224xbf16>
    %32 = vector.shape_cast %31 : vector<1x8x224xbf16> to vector<8x224xbf16>
    %c5 = arith.constant 5 : index
    %c0_30 = arith.constant 0 : index
    %c0_31 = arith.constant 0 : index
    %33 = vector.load %arg2[%c5, %c0_30, %c0_31] : memref<9x8x8xbf16, #tpu.memory_space<vmem>>, vector<1x8x8xbf16>
    %34 = vector.shape_cast %33 : vector<1x8x8xbf16> to vector<8x8xbf16>
    %cst_32 = arith.constant dense<0.000000e+00> : vector<8x224xf32>
    %35 = tpu.matmul %34, %32, %cst_32 {dimension_numbers = #tpu.dot_dimension_numbers<[1], [0], [0], [1], [0, 0, 1, 1], [], []>} : vector<8x8xbf16>, vector<8x224xbf16>, vector<8x224xf32> -> vector<8x224xf32>
    %36 = arith.addf %30, %35 : vector<8x224xf32>
    %c0_33 = arith.constant 0 : index
    %c0_34 = arith.constant 0 : index
    %c32 = arith.constant 32 : index
    %37 = vector.load %arg1[%c0_33, %c0_34, %c32] : memref<1x8x384xbf16, #tpu.memory_space<vmem>>, vector<1x8x224xbf16>
    %38 = vector.shape_cast %37 : vector<1x8x224xbf16> to vector<8x224xbf16>
    %c6 = arith.constant 6 : index
    %c0_35 = arith.constant 0 : index
    %c0_36 = arith.constant 0 : index
    %39 = vector.load %arg2[%c6, %c0_35, %c0_36] : memref<9x8x8xbf16, #tpu.memory_space<vmem>>, vector<1x8x8xbf16>
    %40 = vector.shape_cast %39 : vector<1x8x8xbf16> to vector<8x8xbf16>
    %cst_37 = arith.constant dense<0.000000e+00> : vector<8x224xf32>
    %41 = tpu.matmul %40, %38, %cst_37 {dimension_numbers = #tpu.dot_dimension_numbers<[1], [0], [0], [1], [0, 0, 1, 1], [], []>} : vector<8x8xbf16>, vector<8x224xbf16>, vector<8x224xf32> -> vector<8x224xf32>
    %42 = arith.addf %36, %41 : vector<8x224xf32>
    %c0_38 = arith.constant 0 : index
    %c0_39 = arith.constant 0 : index
    %c33 = arith.constant 33 : index
    %43 = vector.load %arg1[%c0_38, %c0_39, %c33] : memref<1x8x384xbf16, #tpu.memory_space<vmem>>, vector<1x8x224xbf16>
    %44 = vector.shape_cast %43 : vector<1x8x224xbf16> to vector<8x224xbf16>
    %c7 = arith.constant 7 : index
    %c0_40 = arith.constant 0 : index
    %c0_41 = arith.constant 0 : index
    %45 = vector.load %arg2[%c7, %c0_40, %c0_41] : memref<9x8x8xbf16, #tpu.memory_space<vmem>>, vector<1x8x8xbf16>
    %46 = vector.shape_cast %45 : vector<1x8x8xbf16> to vector<8x8xbf16>
    %cst_42 = arith.constant dense<0.000000e+00> : vector<8x224xf32>
    %47 = tpu.matmul %46, %44, %cst_42 {dimension_numbers = #tpu.dot_dimension_numbers<[1], [0], [0], [1], [0, 0, 1, 1], [], []>} : vector<8x8xbf16>, vector<8x224xbf16>, vector<8x224xf32> -> vector<8x224xf32>
    %48 = arith.addf %42, %47 : vector<8x224xf32>
    %c0_43 = arith.constant 0 : index
    %c0_44 = arith.constant 0 : index
    %c34 = arith.constant 34 : index
    %49 = vector.load %arg1[%c0_43, %c0_44, %c34] : memref<1x8x384xbf16, #tpu.memory_space<vmem>>, vector<1x8x224xbf16>
    %50 = vector.shape_cast %49 : vector<1x8x224xbf16> to vector<8x224xbf16>
    %c8 = arith.constant 8 : index
    %c0_45 = arith.constant 0 : index
    %c0_46 = arith.constant 0 : index
    %51 = vector.load %arg2[%c8, %c0_45, %c0_46] : memref<9x8x8xbf16, #tpu.memory_space<vmem>>, vector<1x8x8xbf16>
    %52 = vector.shape_cast %51 : vector<1x8x8xbf16> to vector<8x8xbf16>
    %cst_47 = arith.constant dense<0.000000e+00> : vector<8x224xf32>
    %53 = tpu.matmul %52, %50, %cst_47 {dimension_numbers = #tpu.dot_dimension_numbers<[1], [0], [0], [1], [0, 0, 1, 1], [], []>} : vector<8x8xbf16>, vector<8x224xbf16>, vector<8x224xf32> -> vector<8x224xf32>
    %54 = arith.addf %48, %53 : vector<8x224xf32>
    %c0_48 = arith.constant 0 : index
    %c0_49 = arith.constant 0 : index
    %55 = vector.load %arg3[%c0_48, %c0_49] : memref<8x1xf32, #tpu.memory_space<vmem>>, vector<8x1xf32>
    %56 = vector.broadcast %55 : vector<8x1xf32> to vector<8x224xf32>
    %57 = arith.mulf %54, %56 : vector<8x224xf32>
    %c0_50 = arith.constant 0 : index
    %c0_51 = arith.constant 0 : index
    %58 = vector.load %arg4[%c0_50, %c0_51] : memref<8x1xf32, #tpu.memory_space<vmem>>, vector<8x1xf32>
    %59 = vector.broadcast %58 : vector<8x1xf32> to vector<8x224xf32>
    %60 = arith.addf %57, %59 : vector<8x224xf32>
    %cst_52 = arith.constant 0.000000e+00 : f32
    %61 = vector.broadcast %cst_52 : f32 to vector<8x224xf32>
    %62 = arith.maximumf %60, %61 : vector<8x224xf32>
    %c0_53 = arith.constant 0 : index
    %c0_54 = arith.constant 0 : index
    %c0_55 = arith.constant 0 : index
    %63 = vector.load %arg5[%c0_53, %c0_54, %c0_55] : memref<1x8x224xf32, #tpu.memory_space<vmem>>, vector<1x8x224xf32>
    %64 = vector.shape_cast %63 : vector<1x8x224xf32> to vector<8x224xf32>
    %65 = vector.shape_cast %62 : vector<8x224xf32> to vector<1x8x224xf32>
    tpu.vector_store %arg5[%c0_53, %c0_54, %c0_55], %65 {strides = array<i32>} : memref<1x8x224xf32, #tpu.memory_space<vmem>>, vector<1x8x224xf32>,
    return
  }
  func.func @transform_0(%arg0: i32) -> (i32, i32, i32) {
    %c0_i32 = arith.constant 0 : i32
    %c0_i32_0 = arith.constant 0 : i32
    %c0_i32_1 = arith.constant 0 : i32
    return %arg0, %c0_i32, %c0_i32_0 : i32, i32, i32
  }
  func.func @transform_1(%arg0: i32) -> (i32, i32, i32) {
    %c0_i32 = arith.constant 0 : i32
    %c0_i32_0 = arith.constant 0 : i32
    %c0_i32_1 = arith.constant 0 : i32
    %c0_i32_2 = arith.constant 0 : i32
    return %c0_i32, %c0_i32_0, %c0_i32_1 : i32, i32, i32
  }
  func.func @transform_2(%arg0: i32) -> (i32, i32) {
    %c0_i32 = arith.constant 0 : i32
    %c0_i32_0 = arith.constant 0 : i32
    %c0_i32_1 = arith.constant 0 : i32
    return %c0_i32, %c0_i32_0 : i32, i32
  }
  func.func @transform_3(%arg0: i32) -> (i32, i32) {
    %c0_i32 = arith.constant 0 : i32
    %c0_i32_0 = arith.constant 0 : i32
    %c0_i32_1 = arith.constant 0 : i32
    return %c0_i32, %c0_i32_0 : i32, i32
  }
  func.func @transform_4(%arg0: i32) -> (i32, i32, i32) {
    %c0_i32 = arith.constant 0 : i32
    %c0_i32_0 = arith.constant 0 : i32
    %c0_i32_1 = arith.constant 0 : i32
    return %arg0, %c0_i32, %c0_i32_0 : i32, i32, i32
  }
}

</mosaic_0001>

<bundles_post_ra>
// kernel: conv_block_forward.2
= control target key start
LH: loop header
LB: loop body
LE: loop exit
PB: predicated region body
PF: predicated region fallthrough
CT: control target
= control target key end

     0   :  { %s977_s15 = smov 0   ;;  %s1074_s0 = inlined_call_operand.vmem [shape: bf16[2,8,384], index: 0, kind: input, shape index: {}]   ;;  %s1075_s1 = inlined_call_operand.vmem [shape: bf16[9,8,8], index: 1, kind: input, shape index: {}]   ;;  %s1076_s2 = inlined_call_operand.vmem [shape: f32[1,224], index: 2, kind: input, shape index: {}]   ;;  %s1077_s3 = inlined_call_operand.vmem [shape: f32[2,8,1], index: 3, kind: output, shape index: {0}]   ;;  %s1078_s4 = inlined_call_operand.vmem [shape: f32[2,8,1], index: 4, kind: output, shape index: {1}]  }
   0x1 LB: > { %s873_s16 = sadd.s32 4294967295, %s941_s15   ;;  %p877_p0 = scmp.ge.s32.totalorder %s941_s15, 1  ;;  %s941_s15 = sphi %s977_s15, %s15_s15  }
   0x2   : > { %p165_p1 = scmp.lt.s32.totalorder %s941_s15, 3 }
   0x4   : > { %p166_p2 = pnand %p877_p0, %p165_p1 }
   0x5   : > { %p194_p3 = scmp.lt.s32.totalorder (!%p166_p2), %s873_s16, 1  ;;  %s944_s21 = smov (!%p166_p2), 126  }
   0x6   : > { %169 = sbr.rel (%p166_p2) target bundleno = 517 (0x205), region = 32  ;;  %s945_s22 = smov (!%p166_p2), 127  }
   0x7   : > { %s946_s25 = smov (!%p166_p2), 112   ;;  %s947_s26 = smov (!%p166_p2), 111  }
   0x8   : > { %s948_s27 = smov (!%p166_p2), 110   ;;  %s949_s28 = smov (!%p166_p2), 96  }
   0x9   : > { %s950_s29 = smov (!%p166_p2), 95   ;;  %s951_s30 = smov (!%p166_p2), 94  }
   0xb   : > { %s1080_s16 = smov (!%p194_p3, %s873_s16), 1  ;;  %v943_v0 = vmov 0   ;;  %vm227_vm0 = vcmask 1043456   ;;  %vm223_vm1 = vcmask 64512   ;;  %v209_v5 = vld [vmem:[%s1075_s1] sm:$0xf] }
   0xc   : > { %s914_s17 = smul.u32 12, %s1080_s16  ;;  %266 = vmatprep.mubr.bf16.mxu0 %v943_v0  ;;  %316 = vmatprep.mubr.bf16.mxu1 %v943_v0  ;;  %vm221_vm2 = vcmask 1039360   ;;  %vm331_vm3 = vcmask 1031168   ;;  %vm391_vm4 = vcmask 916480   ;;  %v881_v14 = vld [vmem:[%s1075_s1 + $0x4] sm:$0xf] }
   0xd   : > { %vm451_vm5 = vcmask 908288   ;;  %v891_v20 = vld [vmem:[%s1075_s1 + $0xc] sm:$0xf]  ;;  %vm511_vm6 = vcmask 900096   ;;  %v888_v24 = vld [vmem:[%s1075_s1 + $0x8] sm:$0xf] }
   0xe   : > { %s993_s20 = scalar_lea.vmem %s1074_s0, %s914_s17  ;;  %vm571_vm7 = vcmask 785408   ;;  %v897_v30 = vld [vmem:[%s1075_s1 + $0x14] sm:$0xf]  ;;  %vm643_vm8 = vcmask 777216   ;;  %v894_v34 = vld [vmem:[%s1075_s1 + $0x10] sm:$0xf] }
   0xf   : > { %v208_v1 = vld [vmem:[%s993_s20] sm:$0xff]  ;;  %v934_v6 = vld [vmem:[%s993_s20 + $0x8] ss:$0 sps:$4 sm:$0xff]   ;;  %vm706_vm9 = vcmask 769024   ;;  %v900_v43 = vld [vmem:[%s1075_s1 + $0x18] sm:$0xf] }
  0x10   : > { %v882_v2 = vcombine.low %v208_v1, %v208_v1  ;;  %v883_v3 = vcombine.high %v208_v1, %v208_v1  ;;  %v903_v46 = vld [vmem:[%s1075_s1 + $0x1c] sm:$0xf]  ;;  %v909_v50 = vld [vmem:[%s1075_s1 + $0x20] sm:$0xf]  ;;  %vm780_vm10 = vcmask 7168  }
  0x12   : > { %327 = vrot.lane.b32.xlu1 %v882_v2, %s944_s21  ;;  %217 = vrot.lane.b32.xlu0 %v882_v2, %s945_s22  ;;  %v279_v4 = vsel %vm227_vm0, %v882_v2, 0 }
  0x13   : > { %886 = vmatprep.subr.msk.bf16.mxu1 %vm227_vm0, %v883_v3 }
  0x14   : > { %299 = vmatpush1.bf16.msra.mxu1 %v279_v4 }
  0x16   : > { %329 = vrot.lane.b32.xlu1 %v883_v3, %s944_s21  ;;  %219 = vrot.lane.b32.xlu0 %v883_v3, %s945_s22 }
  0x17   : > { %887 = vmatmul.mubr.msk.bf16.vlgmr.msra.gmra.mxu1 %vm223_vm1, %v209_v5 }
  0x18   : > { %434 = vmatprep.mubr.bf16.mxu1 %v943_v0 }
  0x1a   : > { %389 = vrot.lane.b32.xlu1 %v883_v3, %s946_s25  ;;  %387 = vrot.lane.b32.xlu0 %v882_v2, %s946_s25  ;;  %s879_s25 = sshll.u32 %s1080_s16, 3 }
  0x1b   : > { %s206_s5 = scalar_lea.vmem %s1078_s4, %s879_s25 }
  0x1e   : > { %449 = vrot.lane.b32.xlu1 %v883_v3, %s947_s26  ;;  %447 = vrot.lane.b32.xlu0 %v882_v2, %s947_s26 }
  0x22   : > { %509 = vrot.lane.b32.xlu1 %v883_v3, %s948_s27  ;;  %507 = vrot.lane.b32.xlu0 %v882_v2, %s948_s27 }
  0x26   : > { %569 = vrot.lane.b32.xlu1 %v883_v3, %s949_s28  ;;  %567 = vrot.lane.b32.xlu0 %v882_v2, %s949_s28  ;;  %s202_s28 = scalar_lea.vmem %s1077_s3, %s879_s25 }
  0x2a   : > { %639 = vrot.lane.b32.xlu1 %v883_v3, %s950_s29  ;;  %637 = vrot.lane.b32.xlu0 %v882_v2, %s950_s29 }
  0x2e   : > { %700 = vrot.lane.b32.xlu1 %v882_v2, %s951_s30  ;;  %641 = vrot.lane.b32.xlu0 %v934_v6, %s950_s29 }
  0x32   : > { %704 = vrot.lane.b32.xlu1 %v934_v6, %s951_s30  ;;  %702 = vrot.lane.b32.xlu0 %v883_v3, %s951_s30 }
  0x84   : > { %v328_v7 = vpop.permute.xlu1 %327  ;;  %v218_v8 = vpop.permute.xlu0 %217 }
  0x88   : > { %v330_v9 = vpop.permute.xlu1 %329  ;;  %v220_v10 = vpop.permute.xlu0 %219 }
  0x89   : > { %884 = vmatprep.subr.msk.bf16.mxu0 %vm227_vm0, %v220_v10  ;;  %v222_v11 = vsel %vm221_vm2, %v218_v8, %v220_v10  ;;  %v332_v13 = vsel %vm331_vm3, %v328_v7, %v330_v9 }
  0x8a   : > { %v229_v12 = vsel %vm227_vm0, %v222_v11, 0  ;;  %v337_v18 = vsel %vm227_vm0, %v332_v13, 0 }
  0x8b   : > { %249 = vmatpush1.bf16.msra.mxu0 %v229_v12 }
  0x8c   : > { %v390_v15 = vpop.permute.xlu1 %389  ;;  %889 = vmatprep.subr.msk.bf16.mxu0 %vm227_vm0, %v330_v9  ;;  %v388_v16 = vpop.permute.xlu0 %387 }
  0x8d   : > { %v392_v17 = vsel %vm391_vm4, %v388_v16, %v390_v15  ;;  %892 = vmatprep.subr.msk.bf16.mxu1 %vm227_vm0, %v390_v15  ;;  %v763_v15 = vlaneseq }
  0x8e   : > { %v397_v19 = vsel %vm227_vm0, %v392_v17, 0  ;;  %885 = vmatmul.mubr.msk.bf16.vlgmr.msra.gmra.mxu0 %vm223_vm1, %v881_v14 }
  0x8f   : > { %357 = vmatpush1.bf16.msra.mxu0 %v337_v18  ;;  %417 = vmatpush1.bf16.msra.mxu1 %v397_v19 }
  0x90   : > { %v450_v21 = vpop.permute.xlu1 %449  ;;  %v448_v22 = vpop.permute.xlu0 %447  ;;  %374 = vmatprep.mubr.bf16.mxu0 %v943_v0 }
  0x91   : > { %v452_v23 = vsel %vm451_vm5, %v448_v22, %v450_v21  ;;  %895 = vmatprep.subr.msk.bf16.mxu0 %vm227_vm0, %v450_v21  ;;  %v764_v21 = vshrl.u32 %v763_v15, 7 }
  0x92   : > { %893 = vmatmul.mubr.msk.bf16.vlgmr.msra.gmra.mxu1 %vm223_vm1, %v891_v20  ;;  %v457_v25 = vsel %vm227_vm0, %v452_v23, 0 }
  0x93   : > { %554 = vmatprep.mubr.bf16.mxu1 %v943_v0 }
  0x94   : > { %v510_v26 = vpop.permute.xlu1 %509  ;;  %v508_v27 = vpop.permute.xlu0 %507 }
  0x95   : > { %v512_v28 = vsel %vm511_vm6, %v508_v27, %v510_v26  ;;  %898 = vmatprep.subr.msk.bf16.mxu1 %vm227_vm0, %v510_v26 }
  0x96   : > { %v517_v29 = vsel %vm227_vm0, %v512_v28, 0  ;;  %890 = vmatmul.mubr.msk.bf16.vlgmr.msra.gmra.mxu0 %vm223_vm1, %v888_v24 }
  0x97   : > { %477 = vmatpush1.bf16.msra.mxu0 %v457_v25  ;;  %537 = vmatpush1.bf16.msra.mxu1 %v517_v29  ;;  %v765_v29 = vsub.s32 0, %v764_v21 }
  0x98   : > { %v570_v31 = vpop.permute.xlu1 %569  ;;  %v568_v32 = vpop.permute.xlu0 %567  ;;  %494 = vmatprep.mubr.bf16.mxu0 %v943_v0 }
  0x99   : > { %v572_v33 = vsel %vm571_vm7, %v568_v32, %v570_v31  ;;  %901 = vmatprep.subr.msk.bf16.mxu0 %vm227_vm0, %v570_v31  ;;  %v761_v32 = vld [vmem:[%s1076_s2] sm:$0x3] }
  0x9a   : > { %899 = vmatmul.mubr.msk.bf16.vlgmr.msra.gmra.mxu1 %vm223_vm1, %v897_v30  ;;  %v577_v35 = vsel %vm227_vm0, %v572_v33, 0  ;;  %v769_v33 = vsub.s32 1, %v764_v21 }
  0x9b   : > { %687 = vmatprep.mubr.bf16.mxu1 %v943_v0 }
  0x9c   : > { %v640_v36 = vpop.permute.xlu1 %639  ;;  %v638_v37 = vpop.permute.xlu0 %637 }
  0x9d   : > { %v644_v38 = vsel %vm643_vm8, %v638_v37, %v640_v36 }
  0x9e   : > { %896 = vmatmul.mubr.msk.bf16.vlgmr.msra.gmra.mxu0 %vm223_vm1, %v894_v34  ;;  %v650_v39 = vsel %vm227_vm0, %v644_v38, 0  ;;  %v766_v38 = vrot.slane %v761_v32, %v765_v29 }
  0x9f   : > { %597 = vmatpush1.bf16.msra.mxu0 %v577_v35  ;;  %614 = vmatprep.mubr.bf16.mxu0 %v943_v0 }
  0xa0   : > { %v701_v40 = vpop.permute.xlu1 %700  ;;  %v642_v41 = vpop.permute.xlu0 %641 }
  0xa1   : > { %v645_v42 = vsel %vm643_vm8, %v640_v36, %v642_v41  ;;  %v770_v41 = vrot.slane %v761_v32, %v769_v33 }
  0xa2   : > { %907 = vmatprep.subr.msk.bf16.mxu1 %vm227_vm0, %v645_v42 }
  0xa3   : > { %670 = vmatpush1.bf16.msra.mxu1 %v650_v39 }
  0xa4   : > { %v705_v44 = vpop.permute.xlu1 %704  ;;  %v703_v45 = vpop.permute.xlu0 %702 }
  0xa5   : > { %v707_v47 = vsel %vm706_vm9, %v701_v40, %v703_v45  ;;  %v708_v48 = vsel %vm706_vm9, %v703_v45, %v705_v44 }
  0xa6   : > { %v713_v49 = vsel %vm227_vm0, %v707_v47, 0  ;;  %902 = vmatmul.mubr.msk.bf16.vlgmr.msra.gmra.mxu0 %vm223_vm1, %v900_v43  ;;  %910 = vmatprep.subr.msk.bf16.mxu0 %vm227_vm0, %v708_v48 }
  0xa7   : > { %908 = vmatmul.mubr.msk.bf16.vlgmr.msra.gmra.mxu1 %vm223_vm1, %v903_v46  ;;  %733 = vmatpush1.bf16.msra.mxu0 %v713_v49 }
  0xa8   : > { %750 = vmatprep.mubr.bf16.mxu0 %v943_v0 }
  0xae   : > { %911 = vmatmul.mubr.msk.bf16.vlgmr.msra.gmra.mxu0 %vm223_vm1, %v909_v50 }
  0xd7   : > { %v318_v51 = vpop.f32.mrf.mxu1 }
  0xd9   : > { %v320_v52 = vpop.f32.mrf.mxu1 }
  0xdb   : > { %v322_v53 = vpop.f32.mrf.mxu1 }
  0xdd   : > { %v323_v54 = vpop.f32.mrf.mxu1 }
 0x14e   : > { %v268_v55 = vpop.f32.mrf.mxu0 }
 0x14f   : > { %v319_v3 = vadd.f32 %v318_v51, %v268_v55 }
 0x150   : > { %v270_v56 = vpop.f32.mrf.mxu0 }
 0x151   : > { %v321_v6 = vadd.f32 %v320_v52, %v270_v56 }
 0x152   : > { %v272_v57 = vpop.f32.mrf.mxu0  ;;  %v436_v58 = vpop.f32.mrf.mxu1 }
 0x154   : > { %v273_v59 = vpop.f32.mrf.mxu0  ;;  %v438_v60 = vpop.f32.mrf.mxu1 }
 0x156   : > { %v376_v61 = vpop.f32.mrf.mxu0  ;;  %v440_v62 = vpop.f32.mrf.mxu1 }
 0x157   : > { %v383_v7 = vadd.f32 %v376_v61, %v319_v3 }
 0x158   : > { %v378_v63 = vpop.f32.mrf.mxu0  ;;  %v441_v0 = vpop.f32.mrf.mxu1 }
 0x159   : > { %v384_v10 = vadd.f32 %v378_v63, %v321_v6  ;;  %v443_v13 = vadd.f32 %v436_v58, %v383_v7 }
 0x15a   : > { %v380_v1 = vpop.f32.mrf.mxu0  ;;  %v556_v2 = vpop.f32.mrf.mxu1 }
 0x15b   : > { %v444_v16 = vadd.f32 %v438_v60, %v384_v10 }
 0x15c   : > { %v381_v4 = vpop.f32.mrf.mxu0  ;;  %v558_v5 = vpop.f32.mrf.mxu1 }
 0x15e   : > { %v496_v8 = vpop.f32.mrf.mxu0  ;;  %v560_v9 = vpop.f32.mrf.mxu1 }
 0x15f   : > { %v503_v17 = vadd.f32 %v496_v8, %v443_v13 }
 0x160   : > { %v498_v11 = vpop.f32.mrf.mxu0  ;;  %v561_v12 = vpop.f32.mrf.mxu1 }
 0x161   : > { %v504_v19 = vadd.f32 %v498_v11, %v444_v16  ;;  %v563_v22 = vadd.f32 %v556_v2, %v503_v17 }
 0x162   : > { %v500_v14 = vpop.f32.mrf.mxu0 }
 0x163   : > { %v564_v25 = vadd.f32 %v558_v5, %v504_v19 }
 0x164   : > { %v501_v18 = vpop.f32.mrf.mxu0 }
 0x166   : > { %v616_v20 = vpop.f32.mrf.mxu0 }
 0x167   : > { %v689_v23 = vpop.f32.mrf.mxu1  ;;  %v623_v26 = vadd.f32 %v616_v20, %v563_v22 }
 0x168   : > { %v618_v24 = vpop.f32.mrf.mxu0 }
 0x169   : > { %v691_v27 = vpop.f32.mrf.mxu1  ;;  %v624_v30 = vadd.f32 %v618_v24, %v564_v25  ;;  %v696_v35 = vadd.f32 %v689_v23, %v623_v26 }
 0x16a   : > { %v620_v28 = vpop.f32.mrf.mxu0 }
 0x16b   : > { %v693_v31 = vpop.f32.mrf.mxu1  ;;  %v697_v39 = vadd.f32 %v691_v27, %v624_v30 }
 0x16c   : > { %v621_v34 = vpop.f32.mrf.mxu0 }
 0x16d   : > { %v694_v36 = vpop.f32.mrf.mxu1 }
 0x16e   : > { %v752_v37 = vpop.f32.mrf.mxu0 }
 0x16f   : > { %v759_v40 = vadd.f32 %v752_v37, %v696_v35 }
 0x170   : > { %v754_v42 = vpop.f32.mrf.mxu0 }
 0x171   : > { %v760_v43 = vadd.f32 %v754_v42, %v697_v39  ;;  %v773_v44 = vmul.f32 %v766_v38, %v759_v40 }
 0x172   : > { %v756_v45 = vpop.f32.mrf.mxu0 }
 0x173   : > { %v774_v46 = vmul.f32 %v770_v41, %v760_v43  ;;  %v782_v51 = vmul.f32 %v773_v44, %v773_v44 }
 0x174   : > { %v757_v47 = vpop.f32.mrf.mxu0 }
 0x175   : > { %v776_v48 = vsel %vm571_vm7, %v774_v46, 0.0  ;;  %v783_v49 = vmul.f32 %v774_v46, %v774_v46 }
 0x176   : > { %v777_v50 = vadd.f32 %v776_v48, %v773_v44 }
 0x177   : > { %v784_v52 = vsel %vm571_vm7, %v783_v49, 0.0 }
 0x178   : > { %778 = vadd.xlane.f32.xlu0 %v777_v50  ;;  %v785_v53 = vadd.f32 %v784_v52, %v782_v51 }
 0x17a   : > { %786 = vadd.xlane.f32.xlu1 %v785_v53 }
 0x201   : > { %v779_v54 = vpop.xlane.xlu0 %778 }
 0x202   : > { %781 = vst.msk [vmem:[%s202_s28] sm:$0xff] %vm780_vm10, %v779_v54 }
 0x203   : > { %v787_v55 = vpop.xlane.xlu1 %786 }
 0x204   : > { %788 = vst.msk [vmem:[%s206_s5] sm:$0xff] %vm780_vm10, %v787_v55 }
 0x205 PF: > { %s15_s15 = sadd.s32 1, %s941_s15  }
 0x206   : > { %p12_p4 = scmp.ge.s32.totalorder %s15_s15, 4  }
 0x208   :  { %14 = sbr.rel (!%p12_p4) target bundleno = 1 (0x1), region = 82 }

// kernel: conv_block_forward.3
= control target key start
LH: loop header
LB: loop body
LE: loop exit
PB: predicated region body
PF: predicated region fallthrough
CT: control target
= control target key end

     0   :  { %s935_s15 = smov 0   ;;  %s1033_s0 = inlined_call_operand.vmem [shape: bf16[2,8,384], index: 0, kind: input, shape index: {}]   ;;  %s1034_s1 = inlined_call_operand.vmem [shape: bf16[9,8,8], index: 1, kind: input, shape index: {}]   ;;  %s1035_s2 = inlined_call_operand.vmem [shape: f32[8,1], index: 2, kind: input, shape index: {}]   ;;  %s1036_s3 = inlined_call_operand.vmem [shape: f32[8,1], index: 3, kind: input, shape index: {}]   ;;  %s1037_s4 = inlined_call_operand.vmem [shape: f32[2,8,224], index: 4, kind: output, shape index: {}]  }
   0x1 LB: > { %s828_s16 = sadd.s32 4294967295, %s899_s15   ;;  %p832_p0 = scmp.ge.s32.totalorder %s899_s15, 1  ;;  %s899_s15 = sphi %s935_s15, %s14_s15  }
   0x2   : > { %p162_p1 = scmp.lt.s32.totalorder %s899_s15, 3 }
   0x4   : > { %p163_p2 = pnand %p832_p0, %p162_p1 }
   0x5   : > { %p188_p3 = scmp.lt.s32.totalorder (!%p163_p2), %s828_s16, 1  ;;  %s902_s21 = smov (!%p163_p2), 126  }
   0x6   : > { %166 = sbr.rel (%p163_p2) target bundleno = 378 (0x17a), region = 36  ;;  %s903_s22 = smov (!%p163_p2), 127  }
   0x7   : > { %s904_s25 = smov (!%p163_p2), 112   ;;  %s905_s26 = smov (!%p163_p2), 111  }
   0x8   : > { %s906_s27 = smov (!%p163_p2), 110   ;;  %s907_s28 = smov (!%p163_p2), 96  }
   0x9   : > { %s908_s29 = smov (!%p163_p2), 95   ;;  %s909_s30 = smov (!%p163_p2), 94  }
   0xb   : > { %s1039_s16 = smov (!%p188_p3, %s828_s16), 1  ;;  %v901_v0 = vmov 0   ;;  %vm218_vm0 = vcmask 1043456   ;;  %vm214_vm1 = vcmask 64512   ;;  %v200_v5 = vld [vmem:[%s1034_s1] sm:$0xf] }
   0xc   : > { %s870_s17 = smul.u32 12, %s1039_s16  ;;  %257 = vmatprep.mubr.bf16.mxu0 %v901_v0  ;;  %307 = vmatprep.mubr.bf16.mxu1 %v901_v0  ;;  %v752_v7 = vld [vmem:[%s1035_s2] sm:$0xff]  ;;  %vm212_vm2 = vcmask 1039360   ;;  %vm322_vm3 = vcmask 1031168   ;;  %vm382_vm4 = vcmask 916480   ;;  %vm442_vm5 = vcmask 908288  }
   0xd   : > { %888 = vset.pattern.permute.xlu0 %v901_v0  ;;  %889 = vset.pattern.permute.xlu1 %v901_v0  ;;  %v760_v8 = vld [vmem:[%s1036_s3] sm:$0xff]  ;;  %v846_v22 = vld [vmem:[%s1034_s1 + $0xc] sm:$0xf]  ;;  %vm502_vm6 = vcmask 900096   ;;  %v843_v26 = vld [vmem:[%s1034_s1 + $0x8] sm:$0xf] }
   0xe   : > { %s951_s20 = scalar_lea.vmem %s1033_s0, %s870_s17  ;;  %v836_v16 = vld [vmem:[%s1034_s1 + $0x4] sm:$0xf]  ;;  %vm562_vm7 = vcmask 785408   ;;  %v852_v32 = vld [vmem:[%s1034_s1 + $0x14] sm:$0xf]  ;;  %vm634_vm8 = vcmask 777216  }
   0xf   : > { %v199_v1 = vld [vmem:[%s951_s20] sm:$0xff]  ;;  %v892_v6 = vld [vmem:[%s951_s20 + $0x8] ss:$0 sps:$4 sm:$0xff]   ;;  %v849_v36 = vld [vmem:[%s1034_s1 + $0x10] sm:$0xf]  ;;  %vm697_vm9 = vcmask 769024  }
  0x10   : > { %v837_v2 = vcombine.low %v199_v1, %v199_v1  ;;  %v838_v3 = vcombine.high %v199_v1, %v199_v1  ;;  %v855_v45 = vld [vmem:[%s1034_s1 + $0x18] sm:$0xf]  ;;  %v858_v48 = vld [vmem:[%s1034_s1 + $0x1c] sm:$0xf]  ;;  %v864_v52 = vld [vmem:[%s1034_s1 + $0x20] sm:$0xf] }
  0x12   : > { %318 = vrot.lane.b32.xlu1 %v837_v2, %s902_s21  ;;  %208 = vrot.lane.b32.xlu0 %v837_v2, %s903_s22  ;;  %v270_v4 = vsel %vm218_vm0, %v837_v2, 0 }
  0x13   : > { %841 = vmatprep.subr.msk.bf16.mxu1 %vm218_vm0, %v838_v3 }
  0x14   : > { %290 = vmatpush1.bf16.msra.mxu1 %v270_v4 }
  0x16   : > { %320 = vrot.lane.b32.xlu1 %v838_v3, %s902_s21  ;;  %210 = vrot.lane.b32.xlu0 %v838_v3, %s903_s22 }
  0x17   : > { %842 = vmatmul.mubr.msk.bf16.vlgmr.msra.gmra.mxu1 %vm214_vm1, %v200_v5 }
  0x18   : > { %425 = vmatprep.mubr.bf16.mxu1 %v901_v0 }
  0x1a   : > { %380 = vrot.lane.b32.xlu1 %v838_v3, %s904_s25  ;;  %378 = vrot.lane.b32.xlu0 %v837_v2, %s904_s25 }
  0x1e   : > { %440 = vrot.lane.b32.xlu1 %v838_v3, %s905_s26  ;;  %438 = vrot.lane.b32.xlu0 %v837_v2, %s905_s26 }
  0x22   : > { %500 = vrot.lane.b32.xlu1 %v838_v3, %s906_s27  ;;  %498 = vrot.lane.b32.xlu0 %v837_v2, %s906_s27  ;;  %s869_s27 = sshll.u32 %s1039_s16, 4 }
  0x26   : > { %560 = vrot.lane.b32.xlu1 %v838_v3, %s907_s28  ;;  %558 = vrot.lane.b32.xlu0 %v837_v2, %s907_s28 }
  0x2a   : > { %630 = vrot.lane.b32.xlu1 %v838_v3, %s908_s29  ;;  %628 = vrot.lane.b32.xlu0 %v837_v2, %s908_s29 }
  0x2e   : > { %691 = vrot.lane.b32.xlu1 %v837_v2, %s909_s30  ;;  %632 = vrot.lane.b32.xlu0 %v892_v6, %s908_s29 }
  0x32   : > { %695 = vrot.lane.b32.xlu1 %v892_v6, %s909_s30  ;;  %693 = vrot.lane.b32.xlu0 %v838_v3, %s909_s30  ;;  %s197_s30 = scalar_lea.vmem %s1037_s4, %s869_s27 }
  0x36   : > { %755 = vperm.xlu0 %888, %v752_v7   ;;  %763 = vperm.xlu1 %889, %v760_v8  }
  0x84   : > { %v319_v9 = vpop.permute.xlu1 %318  ;;  %v209_v10 = vpop.permute.xlu0 %208 }
  0x88   : > { %v321_v11 = vpop.permute.xlu1 %320  ;;  %v211_v12 = vpop.permute.xlu0 %210 }
  0x89   : > { %839 = vmatprep.subr.msk.bf16.mxu0 %vm218_vm0, %v211_v12  ;;  %v213_v13 = vsel %vm212_vm2, %v209_v10, %v211_v12  ;;  %v323_v15 = vsel %vm322_vm3, %v319_v9, %v321_v11 }
  0x8a   : > { %v220_v14 = vsel %vm218_vm0, %v213_v13, 0  ;;  %v328_v20 = vsel %vm218_vm0, %v323_v15, 0 }
  0x8b   : > { %240 = vmatpush1.bf16.msra.mxu0 %v220_v14 }
  0x8c   : > { %v381_v17 = vpop.permute.xlu1 %380  ;;  %844 = vmatprep.subr.msk.bf16.mxu0 %vm218_vm0, %v321_v11  ;;  %v379_v18 = vpop.permute.xlu0 %378 }
  0x8d   : > { %v383_v19 = vsel %vm382_vm4, %v379_v18, %v381_v17  ;;  %847 = vmatprep.subr.msk.bf16.mxu1 %vm218_vm0, %v381_v17 }
  0x8e   : > { %v388_v21 = vsel %vm218_vm0, %v383_v19, 0  ;;  %840 = vmatmul.mubr.msk.bf16.vlgmr.msra.gmra.mxu0 %vm214_vm1, %v836_v16 }
  0x8f   : > { %348 = vmatpush1.bf16.msra.mxu0 %v328_v20  ;;  %408 = vmatpush1.bf16.msra.mxu1 %v388_v21 }
  0x90   : > { %v441_v23 = vpop.permute.xlu1 %440  ;;  %v439_v24 = vpop.permute.xlu0 %438  ;;  %365 = vmatprep.mubr.bf16.mxu0 %v901_v0 }
  0x91   : > { %v443_v25 = vsel %vm442_vm5, %v439_v24, %v441_v23  ;;  %850 = vmatprep.subr.msk.bf16.mxu0 %vm218_vm0, %v441_v23 }
  0x92   : > { %848 = vmatmul.mubr.msk.bf16.vlgmr.msra.gmra.mxu1 %vm214_vm1, %v846_v22  ;;  %v448_v27 = vsel %vm218_vm0, %v443_v25, 0 }
  0x93   : > { %545 = vmatprep.mubr.bf16.mxu1 %v901_v0 }
  0x94   : > { %v501_v28 = vpop.permute.xlu1 %500  ;;  %v499_v29 = vpop.permute.xlu0 %498 }
  0x95   : > { %v503_v30 = vsel %vm502_vm6, %v499_v29, %v501_v28  ;;  %853 = vmatprep.subr.msk.bf16.mxu1 %vm218_vm0, %v501_v28 }
  0x96   : > { %v508_v31 = vsel %vm218_vm0, %v503_v30, 0  ;;  %845 = vmatmul.mubr.msk.bf16.vlgmr.msra.gmra.mxu0 %vm214_vm1, %v843_v26 }
  0x97   : > { %468 = vmatpush1.bf16.msra.mxu0 %v448_v27  ;;  %528 = vmatpush1.bf16.msra.mxu1 %v508_v31 }
  0x98   : > { %v561_v33 = vpop.permute.xlu1 %560  ;;  %v559_v34 = vpop.permute.xlu0 %558  ;;  %485 = vmatprep.mubr.bf16.mxu0 %v901_v0 }
  0x99   : > { %v563_v35 = vsel %vm562_vm7, %v559_v34, %v561_v33  ;;  %856 = vmatprep.subr.msk.bf16.mxu0 %vm218_vm0, %v561_v33 }
  0x9a   : > { %854 = vmatmul.mubr.msk.bf16.vlgmr.msra.gmra.mxu1 %vm214_vm1, %v852_v32  ;;  %v568_v37 = vsel %vm218_vm0, %v563_v35, 0 }
  0x9b   : > { %678 = vmatprep.mubr.bf16.mxu1 %v901_v0 }
  0x9c   : > { %v631_v38 = vpop.permute.xlu1 %630  ;;  %v629_v39 = vpop.permute.xlu0 %628 }
  0x9d   : > { %v635_v40 = vsel %vm634_vm8, %v629_v39, %v631_v38 }
  0x9e   : > { %851 = vmatmul.mubr.msk.bf16.vlgmr.msra.gmra.mxu0 %vm214_vm1, %v849_v36  ;;  %v641_v41 = vsel %vm218_vm0, %v635_v40, 0 }
  0x9f   : > { %588 = vmatpush1.bf16.msra.mxu0 %v568_v37  ;;  %605 = vmatprep.mubr.bf16.mxu0 %v901_v0 }
  0xa0   : > { %v692_v42 = vpop.permute.xlu1 %691  ;;  %v633_v43 = vpop.permute.xlu0 %632 }
  0xa1   : > { %v636_v44 = vsel %vm634_vm8, %v631_v38, %v633_v43 }
  0xa2   : > { %862 = vmatprep.subr.msk.bf16.mxu1 %vm218_vm0, %v636_v44 }
  0xa3   : > { %661 = vmatpush1.bf16.msra.mxu1 %v641_v41 }
  0xa4   : > { %v696_v46 = vpop.permute.xlu1 %695  ;;  %v694_v47 = vpop.permute.xlu0 %693 }
  0xa5   : > { %v698_v49 = vsel %vm697_vm9, %v692_v42, %v694_v47  ;;  %v699_v50 = vsel %vm697_vm9, %v694_v47, %v696_v46 }
  0xa6   : > { %v704_v51 = vsel %vm218_vm0, %v698_v49, 0  ;;  %857 = vmatmul.mubr.msk.bf16.vlgmr.msra.gmra.mxu0 %vm214_vm1, %v855_v45  ;;  %865 = vmatprep.subr.msk.bf16.mxu0 %vm218_vm0, %v699_v50 }
  0xa7   : > { %863 = vmatmul.mubr.msk.bf16.vlgmr.msra.gmra.mxu1 %vm214_vm1, %v858_v48  ;;  %724 = vmatpush1.bf16.msra.mxu0 %v704_v51 }
  0xa8   : > { %741 = vmatprep.mubr.bf16.mxu0 %v901_v0 }
  0xae   : > { %866 = vmatmul.mubr.msk.bf16.vlgmr.msra.gmra.mxu0 %vm214_vm1, %v864_v52 }
  0xb1   : > { %v756_v35 = vpop.permute.xlu0 %755  ;;  %v764_v39 = vpop.permute.xlu1 %763 }
  0xd7   : > { %v309_v53 = vpop.f32.mrf.mxu1 }
  0xd9   : > { %v311_v54 = vpop.f32.mrf.mxu1 }
  0xdb   : > { %v313_v55 = vpop.f32.mrf.mxu1 }
  0xdd   : > { %v314_v56 = vpop.f32.mrf.mxu1 }
 0x14e   : > { %v259_v57 = vpop.f32.mrf.mxu0 }
 0x14f   : > { %v310_v5 = vadd.f32 %v309_v53, %v259_v57 }
 0x150   : > { %v261_v58 = vpop.f32.mrf.mxu0 }
 0x151   : > { %v312_v8 = vadd.f32 %v311_v54, %v261_v58 }
 0x152   : > { %v263_v59 = vpop.f32.mrf.mxu0  ;;  %v427_v60 = vpop.f32.mrf.mxu1 }
 0x154   : > { %v264_v61 = vpop.f32.mrf.mxu0  ;;  %v429_v62 = vpop.f32.mrf.mxu1 }
 0x156   : > { %v367_v63 = vpop.f32.mrf.mxu0  ;;  %v431_v1 = vpop.f32.mrf.mxu1 }
 0x157   : > { %v374_v9 = vadd.f32 %v367_v63, %v310_v5 }
 0x158   : > { %v369_v2 = vpop.f32.mrf.mxu0  ;;  %v432_v0 = vpop.f32.mrf.mxu1 }
 0x159   : > { %v375_v12 = vadd.f32 %v369_v2, %v312_v8  ;;  %v434_v15 = vadd.f32 %v427_v60, %v374_v9 }
 0x15a   : > { %v371_v3 = vpop.f32.mrf.mxu0  ;;  %v547_v4 = vpop.f32.mrf.mxu1 }
 0x15b   : > { %v435_v17 = vadd.f32 %v429_v62, %v375_v12 }
 0x15c   : > { %v372_v6 = vpop.f32.mrf.mxu0  ;;  %v549_v7 = vpop.f32.mrf.mxu1 }
 0x15e   : > { %v487_v10 = vpop.f32.mrf.mxu0  ;;  %v551_v11 = vpop.f32.mrf.mxu1 }
 0x15f   : > { %v494_v18 = vadd.f32 %v487_v10, %v434_v15 }
 0x160   : > { %v489_v13 = vpop.f32.mrf.mxu0  ;;  %v552_v14 = vpop.f32.mrf.mxu1 }
 0x161   : > { %v495_v20 = vadd.f32 %v489_v13, %v435_v17  ;;  %v554_v22 = vadd.f32 %v547_v4, %v494_v18 }
 0x162   : > { %v491_v16 = vpop.f32.mrf.mxu0 }
 0x163   : > { %v555_v25 = vadd.f32 %v549_v7, %v495_v20 }
 0x164   : > { %v492_v19 = vpop.f32.mrf.mxu0 }
 0x166   : > { %v607_v21 = vpop.f32.mrf.mxu0 }
 0x167   : > { %v680_v23 = vpop.f32.mrf.mxu1  ;;  %v614_v26 = vadd.f32 %v607_v21, %v554_v22 }
 0x168   : > { %v609_v24 = vpop.f32.mrf.mxu0 }
 0x169   : > { %v682_v27 = vpop.f32.mrf.mxu1  ;;  %v615_v29 = vadd.f32 %v609_v24, %v555_v25  ;;  %v687_v32 = vadd.f32 %v680_v23, %v614_v26 }
 0x16a   : > { %v611_v28 = vpop.f32.mrf.mxu0 }
 0x16b   : > { %v684_v30 = vpop.f32.mrf.mxu1  ;;  %v688_v36 = vadd.f32 %v682_v27, %v615_v29 }
 0x16c   : > { %v612_v31 = vpop.f32.mrf.mxu0 }
 0x16d   : > { %v685_v33 = vpop.f32.mrf.mxu1 }
 0x16e   : > { %v743_v34 = vpop.f32.mrf.mxu0 }
 0x16f   : > { %v750_v37 = vadd.f32 %v743_v34, %v687_v32 }
 0x170   : > { %v745_v38 = vpop.f32.mrf.mxu0 }
 0x171   : > { %v751_v40 = vadd.f32 %v745_v38, %v688_v36  ;;  %v758_v41 = vmul.f32 %v756_v35, %v750_v37 }
 0x172   : > { %v747_v42 = vpop.f32.mrf.mxu0 }
 0x173   : > { %v759_v43 = vmul.f32 %v756_v35, %v751_v40  ;;  %v766_v44 = vadd.f32 %v764_v39, %v758_v41 }
 0x174   : > { %v748_v45 = vpop.f32.mrf.mxu0 }
 0x175   : > { %v767_v46 = vadd.f32 %v764_v39, %v759_v43  ;;  %v768_v47 = vmax.f32 %v766_v44, 0.0 }
 0x177   : > { %v769_v48 = vmax.f32 %v767_v46, 0.0  ;;  %770 = vst [vmem:[%s197_s30] sm:$0xff] %v768_v47 }
 0x179   : > { %772 = vst.msk [vmem:[%s197_s30 + $0x8] sm:$0xff] %vm562_vm7, %v769_v48 }
 0x17a PF: > { %s14_s15 = sadd.s32 1, %s899_s15  }
 0x17b   : > { %p11_p4 = scmp.ge.s32.totalorder %s14_s15, 4  }
 0x17d   :  { %13 = sbr.rel (!%p11_p4) target bundleno = 1 (0x1), region = 74 }

</bundles_post_ra>
